<compile_context>
chip_gen: v7x
topology: tpu7x:2x2x1
jax: 0.10.0
libtpu: 0.0.40
codegen_flags: <defaults>
</compile_context>

<pallas_src>
import math

import jax
import jax.numpy as jnp
from jax.experimental import pallas as pl
from jax.experimental.pallas import tpu as pltpu


def _rotary_kernel(x_ref, cos_ref, sin_ref, y_ref):
    # x_ref / y_ref: (rows, 128) tile of one batch element (batch dim squeezed).
    # cos_ref: pair-expanded cos.  sin_ref: pair-expanded, sign-folded sin
    # (-sin on even lanes, +sin on odd lanes).
    x = x_ref[...].astype(jnp.float32)
    c = cos_ref[...].astype(jnp.float32)
    s = sin_ref[...].astype(jnp.float32)

    w = x.shape[-1]
    # Adjacent-lane swap: swapped[2i] = x[2i+1], swapped[2i+1] = x[2i].
    x_next = pltpu.roll(x, w - 1, axis=1)   # x_next[i] = x[(i + 1) % w]
    x_prev = pltpu.roll(x, 1, axis=1)       # x_prev[i] = x[(i - 1) % w]
    lane = jax.lax.broadcasted_iota(jnp.int32, x.shape, 1)
    swapped = jnp.where((lane & 1) == 0, x_next, x_prev)

    y_ref[...] = (x * c + swapped * s).astype(y_ref.dtype)


def make_rotary_buffers(d: int, max_len: int = 2048, dtype=jnp.float32):
    """Mirrors _Rotary.__init__, plus the pair-expansion / sign-folding that the
    kernel needs, so forward() does no per-call buffer reshuffling."""
    assert d % 2 == 0, "rotary feature dim must be even"
    inv = 1.0 / (10000.0 ** (jnp.arange(0, d, 2, dtype=jnp.float32) / d))
    t = jnp.arange(max_len, dtype=jnp.float32)
    f = jnp.einsum("i,j->ij", t, inv)          # (max_len, d//2)
    sin, cos = jnp.sin(f), jnp.cos(f)
    #   cos_full[t, 2i] = cos_full[t, 2i+1] = cos[t, i]
    #   sin_signed[t, 2i] = -sin[t, i];  sin_signed[t, 2i+1] = +sin[t, i]
    cos_full = jnp.stack((cos, cos), axis=-1).reshape(max_len, d)
    sin_signed = jnp.stack((-sin, sin), axis=-1).reshape(max_len, d)
    return sin_signed.astype(dtype), cos_full.astype(dtype)


def _round_up(a: int, m: int) -> int:
    return -(-a // m) * m


def _choose_row_tile(R: int, B: int, x_itemsize: int, cs_itemsize: int) -> int:
    # Double-buffered VMEM per row of a block: x + y (x.dtype) + cos + sin.
    per_row = 2 * 128 * (2 * x_itemsize + 2 * cs_itemsize)
    budget = 12 * 1024 * 1024          # safe under v5e's 16 MiB scoped default
    cap = min(max(8, budget // per_row), 4096)
    n_tiles = max(1, pl.cdiv(R, cap))
    # v7x megacore: make sure the grid has at least 2 steps when it can.
    if n_tiles * B < 2 and R >= 16:
        n_tiles = 2
    if n_tiles == 1:
        return R
    return min(_round_up(pl.cdiv(R, n_tiles), 8), R)


def rotary_forward(x, sin_signed_full, cos_full):
    """x: (B, T, D) -> (B, T, D); same semantics as _Rotary.forward."""
    B, T, D = x.shape
    max_len, d_buf = sin_signed_full.shape
    if D % 2 != 0:
        raise ValueError("rotary feature dim must be even")
    if D != d_buf:
        raise ValueError(f"feature dim {D} != buffer dim {d_buf}")
    if T > max_len:
        raise ValueError(f"sequence length {T} exceeds max_len {max_len}")

    sin = sin_signed_full[:T]
    cos = cos_full[:T]
    if sin.dtype != x.dtype:
        sin = sin.astype(x.dtype)
        cos = cos.astype(x.dtype)

    # Lane-dense packing: view (T, D) rows as (R, 128).  Pad T (zeros) when
    # (T*D) % 128 != 0 so every store is a full, unmasked 128-lane store.
    # Rotary pairs never straddle a 128-lane boundary because D is even.
    step = 128 // math.gcd(D, 128)
    T_pad = _round_up(T, step)
    if T_pad != T:
        x = jnp.pad(x, ((0, 0), (0, T_pad - T), (0, 0)))
        sin = jnp.pad(sin, ((0, T_pad - T), (0, 0)))
        cos = jnp.pad(cos, ((0, T_pad - T), (0, 0)))

    W = 128
    R = (T_pad * D) // W
    x2 = x.reshape(B, R, W)                    # free contiguous reshape
    c2 = cos.reshape(R, W)
    s2 = sin.reshape(R, W)

    tR = _choose_row_tile(R, B, x.dtype.itemsize, sin.dtype.itemsize)
    nR = pl.cdiv(R, tR)

    cost = pl.CostEstimate(
        flops=int(6 * B * T_pad * D),
        transcendentals=0,
        bytes_accessed=int(2 * B * T_pad * D * x.dtype.itemsize
                           + 2 * T_pad * D * sin.dtype.itemsize),
    )

    y2 = pl.pallas_call(
        _rotary_kernel,
        out_shape=jax.ShapeDtypeStruct((B, R, W), x.dtype),
        grid=(nR, B),  # batch innermost -> sin/cos block index constant across it
        in_specs=[
            pl.BlockSpec((None, tR, W), lambda r, b: (b, r, 0)),
            pl.BlockSpec((tR, W), lambda r, b: (r, 0)),
            pl.BlockSpec((tR, W), lambda r, b: (r, 0)),
        ],
        out_specs=pl.BlockSpec((None, tR, W), lambda r, b: (b, r, 0)),
        compiler_params=pltpu.CompilerParams(
            dimension_semantics=("parallel", "parallel"),
        ),
        cost_estimate=cost,
    )(x2, c2, s2)

    y = y2.reshape(B, T_pad, D)
    if T_pad != T:
        y = y[:, :T, :]
    return y


def rotary_reference(x):
    """Pure-JAX transcription of the PyTorch forward, for verification."""
    _, T, D = x.shape
    inv = 1.0 / (10000.0 ** (jnp.arange(0, D, 2, dtype=jnp.float32) / D))
    t = jnp.arange(T, dtype=jnp.float32)
    f = jnp.einsum("i,j->ij", t, inv)
    sin, cos = jnp.sin(f), jnp.cos(f)
    x1 = x[..., 0::2].astype(jnp.float32)
    x2 = x[..., 1::2].astype(jnp.float32)
    y1 = x1 * cos - x2 * sin
    y2 = x1 * sin + x2 * cos
    return jnp.stack((y1, y2), axis=-1).reshape(x.shape).astype(x.dtype)


if __name__ == "__main__":
    MAX_LEN = 64
    fwd = jax.jit(rotary_forward)

    # Main check: lane-dense path (T*D % 128 == 0).
    B, T, D = 2, 8, 32
    sin_buf, cos_buf = make_rotary_buffers(D, MAX_LEN)
    x = jax.random.normal(jax.random.PRNGKey(0), (B, T, D), dtype=jnp.float32)
    out = jax.block_until_ready(fwd(x, sin_buf, cos_buf))
    ref = rotary_reference(x)
    assert out.shape == (B, T, D)
    assert jnp.allclose(out, ref, atol=1e-5, rtol=1e-5), "mismatch vs reference"

    # Second check: (T*D) % 128 != 0 exercises the pad-to-lane-dense path.
    B2, T2, D2 = 2, 7, 24
    sin2, cos2 = make_rotary_buffers(D2, MAX_LEN)
    xb = jax.random.normal(jax.random.PRNGKey(0), (B2, T2, D2), dtype=jnp.float32)
    out2 = jax.block_until_ready(fwd(xb, sin2, cos2))
    ref2 = rotary_reference(xb)
    assert out2.shape == (B2, T2, D2)
    assert jnp.allclose(out2, ref2, atol=1e-5, rtol=1e-5), "mismatch (padded path)"

    print("KERNEL_OK")
</pallas_src>

<mosaic_0001>
module attributes {stable_mosaic.version = 11 : i64} {
  func.func @_rotary_kernel(%arg0: i32, %arg1: i32, %arg2: memref<1x2x128xf32, #tpu.memory_space<vmem>>, %arg3: memref<2x128xf32, #tpu.memory_space<vmem>>, %arg4: memref<2x128xf32, #tpu.memory_space<vmem>>, %arg5: memref<1x2x128xf32, #tpu.memory_space<vmem>>) attributes {dimension_semantics = [#tpu.dimension_semantics<parallel>, #tpu.dimension_semantics<parallel>], iteration_bounds = array<i64: 1, 2>, scalar_prefetch = 0 : i64, scratch_operands = 0 : i64, tpu.core_type = #tpu.core_type<tc>, window_params = [{transform_indices = @transform_0, window_bounds = array<i64: 1, 2, 128>}, {transform_indices = @transform_1, window_bounds = array<i64: 2, 128>}, {transform_indices = @transform_2, window_bounds = array<i64: 2, 128>}, {transform_indices = @transform_3, window_bounds = array<i64: 1, 2, 128>}]} {
    %c0 = arith.constant 0 : index
    %c0_0 = arith.constant 0 : index
    %c0_1 = arith.constant 0 : index
    %0 = vector.load %arg2[%c0, %c0_0, %c0_1] : memref<1x2x128xf32, #tpu.memory_space<vmem>>, vector<1x2x128xf32>
    %1 = vector.shape_cast %0 : vector<1x2x128xf32> to vector<2x128xf32>
    %c0_2 = arith.constant 0 : index
    %c0_3 = arith.constant 0 : index
    %2 = vector.load %arg3[%c0_2, %c0_3] : memref<2x128xf32, #tpu.memory_space<vmem>>, vector<2x128xf32>
    %c0_4 = arith.constant 0 : index
    %c0_5 = arith.constant 0 : index
    %3 = vector.load %arg4[%c0_4, %c0_5] : memref<2x128xf32, #tpu.memory_space<vmem>>, vector<2x128xf32>
    %c127_i32 = arith.constant 127 : i32
    %4 = tpu.dynamic_rotate %1 by %c127_i32 dim 1 : vector<2x128xf32>, i32 -> vector<2x128xf32>
    %c1_i32 = arith.constant 1 : i32
    %5 = tpu.dynamic_rotate %1 by %c1_i32 dim 1 : vector<2x128xf32>, i32 -> vector<2x128xf32>
    %6 = tpu.iota {dimensions = array<i32: 1>} : vector<2x128xi32>
    %c1_i32_6 = arith.constant 1 : i32
    %7 = vector.broadcast %c1_i32_6 : i32 to vector<2x128xi32>
    %8 = arith.andi %6, %7 : vector<2x128xi32>
    %c0_i32 = arith.constant 0 : i32
    %9 = vector.broadcast %c0_i32 : i32 to vector<2x128xi32>
    %10 = arith.cmpi eq, %8, %9 : vector<2x128xi32>
    %11 = arith.select %10, %4, %5 : vector<2x128xi1>, vector<2x128xf32>
    %12 = arith.mulf %1, %2 : vector<2x128xf32>
    %13 = arith.mulf %11, %3 : vector<2x128xf32>
    %14 = arith.addf %12, %13 : vector<2x128xf32>
    %c0_7 = arith.constant 0 : index
    %c0_8 = arith.constant 0 : index
    %c0_9 = arith.constant 0 : index
    %15 = vector.load %arg5[%c0_7, %c0_8, %c0_9] : memref<1x2x128xf32, #tpu.memory_space<vmem>>, vector<1x2x128xf32>
    %16 = vector.shape_cast %15 : vector<1x2x128xf32> to vector<2x128xf32>
    %17 = vector.shape_cast %14 : vector<2x128xf32> to vector<1x2x128xf32>
    tpu.vector_store %arg5[%c0_7, %c0_8, %c0_9], %17 {strides = array<i32>} : memref<1x2x128xf32, #tpu.memory_space<vmem>>, vector<1x2x128xf32>,
    return
  }
  func.func @transform_0(%arg0: i32, %arg1: i32) -> (i32, i32, i32) {
    %c0_i32 = arith.constant 0 : i32
    %c0_i32_0 = arith.constant 0 : i32
    return %arg1, %arg0, %c0_i32 : i32, i32, i32
  }
  func.func @transform_1(%arg0: i32, %arg1: i32) -> (i32, i32) {
    %c0_i32 = arith.constant 0 : i32
    %c0_i32_0 = arith.constant 0 : i32
    return %arg0, %c0_i32 : i32, i32
  }
  func.func @transform_2(%arg0: i32, %arg1: i32) -> (i32, i32) {
    %c0_i32 = arith.constant 0 : i32
    %c0_i32_0 = arith.constant 0 : i32
    return %arg0, %c0_i32 : i32, i32
  }
  func.func @transform_3(%arg0: i32, %arg1: i32) -> (i32, i32, i32) {
    %c0_i32 = arith.constant 0 : i32
    %c0_i32_0 = arith.constant 0 : i32
    return %arg1, %arg0, %c0_i32 : i32, i32, i32
  }
}

</mosaic_0001>

<bundles_post_ra>
// kernel: rotary_forward.1
= control target key start
LH: loop header
LB: loop body
LE: loop exit
PB: predicated region body
PF: predicated region fallthrough
CT: control target
= control target key end

     0   :  { %s435_s12 = smov 0   ;;  %s437_s13 = smov 0   ;;  %s474_s0 = inlined_call_operand.vmem [shape: f32[2,2,128], index: 0, kind: input, shape index: {}]   ;;  %s475_s1 = inlined_call_operand.vmem [shape: f32[2,128], index: 1, kind: input, shape index: {}]   ;;  %s476_s2 = inlined_call_operand.vmem [shape: f32[2,128], index: 2, kind: input, shape index: {}]   ;;  %s477_s3 = inlined_call_operand.vmem [shape: f32[2,2,128], index: 3, kind: output, shape index: {}]  }
   0x1   :  { %s439_s14 = smov 0  }
   0x2 LB: > { %s22_s15 = sadd.s32 1, %s407_s13  ;;  %p358_p0 = scmp.ge.s32.totalorder %s411_s14, 1  ;;  %s411_s14 = sphi %s439_s14, %s13_s14   ;;  %s407_s13 = sphi %s437_s13, %s479_s13   ;;  %s403_s12 = sphi %s435_s12, %s478_s12  }
   0x3   : > { %p23_p1 = scmp.ge.s32.totalorder %s22_s15, 2  ;;  %p173_p2 = scmp.lt.s32.totalorder %s411_s14, 3 }
   0x5   : > { %s481_s15 = smov (%p23_p1, %s22_s15), 0  ;;  %p174_p3 = pnand %p358_p0, %p173_p2 }
   0x6   : > { %p209_p4 = scmp.lt.s32.totalorder (!%p174_p3), %s403_s12, 1  ;;  %s413_s20 = smov (!%p174_p3), 127   ;;  %v238_v1 = vlaneseq (!%p174_p3)  ;;  %v232_v5 = vld [vmem:[%s475_s1] sm:$0x3] (!%p174_p3) }
   0x7   : > { %177 = sbr.rel (%p174_p3) target bundleno = 143 (0x8f), region = 32  ;;  %s414_s21 = smov (!%p174_p3), 1   ;;  %v233_v6 = vld [vmem:[%s476_s2] sm:$0x3] (!%p174_p3) }
   0x8   : > { %v239_v2 = vand.u32 (!%p174_p3), 127, %v238_v1 }
   0xa   : > { %v240_v3 = vand.u32 (!%p174_p3), 1, %v239_v2 }
   0xc   : > { %vm241_vm0 = vcmp.eq.s32.totalorder (!%p174_p3), %v240_v3, 0 }
   0xe   : > { %s483_s12 = smov (!%p209_p4, %s403_s12), 1 }
   0xf   : > { %s359_s16 = sshll.u32 %s483_s12, 1 }
  0x10   : > { %s215_s19 = scalar_lea.vmem %s474_s0, %s359_s16  ;;  %s230_s28 = scalar_lea.vmem %s477_s3, %s359_s16 }
  0x11   : > { %v231_v0 = vld [vmem:[%s215_s19] sm:$0x3] }
  0x12   : > { %234 = vrot.lane.b32.xlu0 %v231_v0, %s413_s20  ;;  %v243_v7 = vmul.f32 %v232_v5, %v231_v0 }
  0x16   : > { %236 = vrot.lane.b32.xlu0 %v231_v0, %s414_s21 }
  0x84   : > { %v235_v4 = vpop.permute.xlu0 %234 }
  0x88   : > { %v237_v8 = vpop.permute.xlu0 %236 }
  0x89   : > { %v242_v9 = vsel %vm241_vm0, %v235_v4, %v237_v8 }
  0x8a   : > { %v244_v10 = vmul.f32 %v242_v9, %v233_v6 }
  0x8c   : > { %v245_v11 = vadd.f32 %v244_v10, %v243_v7 }
  0x8e   : > { %246 = vst [vmem:[%s230_s28] sm:$0x3] %v245_v11 }
  0x8f PF: > { %s13_s14 = sadd.s32 1, %s411_s14   ;;  %s478_s12 = smov %s407_s13 }
  0x90   : > { %p10_p5 = scmp.ge.s32.totalorder %s13_s14, 4   ;;  %s479_s13 = smov %s481_s15 }
  0x92   :  { %12 = sbr.rel (!%p10_p5) target bundleno = 2 (0x2), region = 68 }

</bundles_post_ra>
